<compile_context>
chip_gen: v5e
topology: v5e:2x2
jax: 0.10.0
libtpu: 0.0.40
codegen_flags: <defaults>
</compile_context>

<pallas_src>
import numpy as np
import jax
import jax.numpy as jnp
from jax import lax
from jax.experimental import pallas as pl
from jax.experimental.pallas import tpu as pltpu

KSIZE = 5            # 5x5 conv-transpose kernel, as in the module usage
PAD = KSIZE - 1
CIN_PAD = 8          # sublane group size per conv tap (>= cin, rest zero)


def _round_up(v, m):
    return (v + m - 1) // m * m


def _make_fused_kernel(size, cout, taps_real, nq, wp):
    """Single fused kernel: MemA attention read -> dynamic conv_transpose2d."""

    def kernel(xflat_ref, keyst_ref, valsf_ref, xpf_ref,   # inputs
               w_ref, conv_ref,                            # outputs
               patch_ref):                                 # VMEM scratch
        # ------------------------------------------------------------------
        # MemA attention read.  keys were pre-transposed to (keysize, size)
        # and tiled cout times in the wrapper, so
        #   logits3[0, co*size + s] = (keys @ x.flatten())[s]
        # with no in-kernel transpose or concatenate.
        # ------------------------------------------------------------------
        logits3 = lax.dot_general(
            xflat_ref[...], keyst_ref[...], (((1,), (0,)), ((), ())),
            preferred_element_type=jnp.float32)              # (1, cout*size)
        logits3 = logits3 - jnp.max(logits3, axis=1, keepdims=True)
        p3 = jnp.exp(logits3)
        # Sum over the tiled row is cout * the true softmax denominator.
        inv = pl.reciprocal(jnp.sum(p3, axis=1, keepdims=True), approx=True)
        att3 = p3 * (inv * float(cout))                      # tiled softmax

        # Block-diagonal selector: A3[co, co2*size + s] = att[s] * (co == co2).
        # One MXU push then produces the whole generated weight slab at once.
        jc = cout * size
        row = lax.broadcasted_iota(jnp.int32, (cout, jc), 0)
        col = lax.broadcasted_iota(jnp.int32, (cout, jc), 1)
        in_block = (col >= row * size) & (col < (row + 1) * size)
        a3 = jnp.where(in_block, jnp.broadcast_to(att3, (cout, jc)), 0.0)

        # Generated conv-transpose weight, (cout, taps_pad): single lane-dense
        # store, and reused below (from registers) as the conv LHS.
        w = lax.dot_general(a3, valsf_ref[...], (((1,), (0,)), ((), ())),
                            preferred_element_type=jnp.float32)
        w_ref[...] = w

        # ------------------------------------------------------------------
        # im2col: 25 aligned (8, nq) block copies.  Each conv tap (kh, kw) is
        # a shifted lane-slice of the flat padded image xpf (8 sublanes, rows
        # cin..7 are zero), stored at an 8-aligned sublane offset.
        #   patch[(kh*K+kw)*8 + ci, q] = xpf[ci, q + (PAD-kh)*wp + (PAD-kw)]
        # Lanes that are not valid output pixels are garbage and get dropped
        # in the wrapper.
        # ------------------------------------------------------------------
        for kh in range(KSIZE):
            for kw in range(KSIZE):
                t = kh * KSIZE + kw
                s = (PAD - kh) * wp + (PAD - kw)
                patch_ref[t * CIN_PAD:(t + 1) * CIN_PAD, :] = \
                    xpf_ref[:, pl.ds(s, nq)]

        # ------------------------------------------------------------------
        # Conv-transpose as ONE MXU contraction: (cout, taps) @ (taps, nq).
        # ------------------------------------------------------------------
        conv_ref[...] = lax.dot_general(
            w[:, :taps_real], patch_ref[...], (((1,), (0,)), ((), ())),
            preferred_element_type=jnp.float32)

    return kernel


def long_mem_forward(x, keys, values, inch, outch):
    """Fused MemA read + conv_transpose2d(x, W, stride=1) with the generated W.

    Returns:
      mem_value: (inch*outch*K*K,)  -- the literal MemA.forward(x) output
      out:       (n, outch, h+K-1, w+K-1) -- conv_transpose2d(x, W) where
                 W = mem_value.reshape(inch, outch, K, K)
    """
    n, cin, h, w = x.shape
    assert cin == inch and cin <= CIN_PAD
    size, keysize = keys.shape
    assert keysize == x.size, "keysize must equal numel(x), as in the module"
    assert values.shape == (size, inch * outch * KSIZE * KSIZE)

    ho, wo = h + KSIZE - 1, w + KSIZE - 1
    hp, wp = h + 2 * PAD, w + 2 * PAD
    lb = hp * wp                              # per-batch padded flat length
    nq = _round_up(n * lb, 128)               # lane-dense conv slab width
    s_max = PAD * wp + PAD                    # largest im2col shift
    ltot = _round_up(s_max + nq, 128)         # flat padded-input row length
    taps_real = KSIZE * KSIZE * CIN_PAD       # 200 (25 taps x 8 sublanes)
    taps_pad = _round_up(taps_real, 128)      # 256 (lane-dense weight slab)

    # Garbage-lane im2col validity: every valid output lane's shifted read
    # stays inside its own batch's padded frame, and the largest shift stays
    # inside the (zero-padded) flat row.
    assert ho - 1 + PAD < hp and wo - 1 + PAD < wp
    assert s_max + nq <= ltot

    # ---- wrapper-side layout work (free / fused under jit) -----------------
    xflat = x.reshape(1, keysize)                        # PyTorch flatten order
    keys_t3 = jnp.tile(keys.T, (1, outch))               # (keysize, outch*size)

    # values permuted to [co*size + s, (kh*K+kw)*8 + ci], ci and taps zero-padded.
    vr = values.reshape(size, cin, outch, KSIZE, KSIZE)
    vr = jnp.transpose(vr, (2, 0, 3, 4, 1))              # (co, s, kh, kw, ci)
    vr = jnp.pad(vr, ((0, 0),) * 4 + ((0, CIN_PAD - cin),))
    vr = vr.reshape(outch, size, taps_real)
    vr = jnp.pad(vr, ((0, 0), (0, 0), (0, taps_pad - taps_real)))
    vals_f = vr.reshape(outch * size, taps_pad)          # (outch*size, 256)

    # Flat, batch-concatenated, zero-padded image: xpf[ci, b*lb + a*wp + c].
    xpad = jnp.pad(x, ((0, 0), (0, 0), (PAD, PAD), (PAD, PAD)))
    xpf = jnp.transpose(xpad, (1, 0, 2, 3)).reshape(cin, n * lb)
    xpf = jnp.pad(xpf, ((0, CIN_PAD - cin), (0, ltot - n * lb)))   # (8, ltot)

    w2d, conv = pl.pallas_call(
        _make_fused_kernel(size, outch, taps_real, nq, wp),
        out_shape=(jax.ShapeDtypeStruct((outch, taps_pad), jnp.float32),
                   jax.ShapeDtypeStruct((outch, nq), jnp.float32)),
        in_specs=[pl.BlockSpec(memory_space=pltpu.MemorySpace.VMEM)] * 4,
        out_specs=(pl.BlockSpec(memory_space=pltpu.MemorySpace.VMEM),
                   pl.BlockSpec(memory_space=pltpu.MemorySpace.VMEM)),
        scratch_shapes=[pltpu.VMEM((taps_real, nq), jnp.float32)],
    )(xflat, keys_t3, vals_f, xpf)

    # MemA output back in its original (ci, co, kh, kw) row-major ordering.
    mem_value = (w2d[:, :taps_real].reshape(outch, KSIZE, KSIZE, CIN_PAD)
                 [..., :cin].transpose(3, 0, 1, 2).reshape(-1))
    # Strip padding / garbage lanes of the lane-dense conv slab -> NCHW.
    out = (conv[:, :n * lb].reshape(outch, n, hp, wp)[:, :, :ho, :wo]
           .transpose(1, 0, 2, 3))
    return mem_value, out


def _numpy_reference(x, keys, values, inch, outch):
    """Literal float64 reimplementation of MemA + the conv-transpose usage."""
    x = np.asarray(x, np.float64)
    keys = np.asarray(keys, np.float64)
    values = np.asarray(values, np.float64)
    att = keys @ x.reshape(-1)
    att = np.exp(att - att.max())
    att = att / att.sum()
    mem_value = (values * att[:, None]).sum(0)
    wgt = mem_value.reshape(inch, outch, KSIZE, KSIZE)
    n, cin, h, ww = x.shape
    out = np.zeros((n, outch, h + KSIZE - 1, ww + KSIZE - 1), np.float64)
    for b in range(n):
        for co in range(outch):
            for ci in range(cin):
                for ih in range(h):
                    for iw in range(ww):
                        out[b, co, ih:ih + KSIZE, iw:iw + KSIZE] += \
                            x[b, ci, ih, iw] * wgt[ci, co]
    return mem_value, out


if __name__ == "__main__":
    # x is (N, inch, H, W); keysize = numel(x); memory size = 16; outch = 3.
    N, INCH, OUTCH, H, W = 2, 3, 3, 8, 8
    SIZE = 16
    KEYSIZE = N * INCH * H * W

    root = jax.random.PRNGKey(0)
    kx, kk, kv = jax.random.split(root, 3)
    x = 0.1 * jax.random.normal(kx, (N, INCH, H, W), jnp.float32)
    keys = jax.random.normal(kk, (SIZE, KEYSIZE), jnp.float32)
    values = jax.random.normal(kv, (SIZE, INCH * OUTCH * KSIZE * KSIZE), jnp.float32)

    fwd = jax.jit(long_mem_forward, static_argnums=(3, 4))
    mem_value, out = fwd(x, keys, values, INCH, OUTCH)
    mem_value, out = jax.block_until_ready((mem_value, out))

    ref_w, ref_out = _numpy_reference(x, keys, values, INCH, OUTCH)
    assert mem_value.shape == (INCH * OUTCH * KSIZE * KSIZE,), mem_value.shape
    assert out.shape == (N, OUTCH, H + KSIZE - 1, W + KSIZE - 1), out.shape
    if not np.allclose(np.asarray(mem_value), ref_w, rtol=2e-2, atol=2e-2):
        raise AssertionError("MemA attention-read output does not match reference")
    if not np.allclose(np.asarray(out), ref_out, rtol=2e-2, atol=2e-2):
        raise AssertionError("conv_transpose2d output does not match reference")
    print("KERNEL_OK")
</pallas_src>

<mosaic_0001>
module attributes {stable_mosaic.version = 11 : i64} {
  func.func @kernel(%arg0: memref<1x384xf32, #tpu.memory_space<vmem>>, %arg1: memref<384x48xf32, #tpu.memory_space<vmem>>, %arg2: memref<48x256xf32, #tpu.memory_space<vmem>>, %arg3: memref<8x640xf32, #tpu.memory_space<vmem>>, %arg4: memref<3x256xf32, #tpu.memory_space<vmem>>, %arg5: memref<3x512xf32, #tpu.memory_space<vmem>>, %arg6: memref<200x512xf32, #tpu.memory_space<vmem>>) attributes {dimension_semantics = [], scalar_prefetch = 0 : i64, scratch_operands = 1 : i64, tpu.core_type = #tpu.core_type<tc>} {
    %c0 = arith.constant 0 : index
    %c0_0 = arith.constant 0 : index
    %0 = vector.load %arg0[%c0, %c0_0] : memref<1x384xf32, #tpu.memory_space<vmem>>, vector<1x384xf32>
    %c0_1 = arith.constant 0 : index
    %c0_2 = arith.constant 0 : index
    %1 = vector.load %arg1[%c0_1, %c0_2] : memref<384x48xf32, #tpu.memory_space<vmem>>, vector<384x48xf32>
    %cst = arith.constant dense<0.000000e+00> : vector<1x48xf32>
    %2 = tpu.matmul %0, %1, %cst {dimension_numbers = #tpu.dot_dimension_numbers<[1], [0], [0], [1], [0, 0, 1, 1], [], []>} : vector<1x384xf32>, vector<384x48xf32>, vector<1x48xf32> -> vector<1x48xf32>
    %cst_3 = arith.constant dense<0xFF800000> : vector<1xf32>
    %3 = vector.multi_reduction <maximumf>, %2, %cst_3 [1] : vector<1x48xf32> to vector<1xf32>
    %4 = vector.shape_cast %3 : vector<1xf32> to vector<1x1xf32>
    %5 = vector.broadcast %4 : vector<1x1xf32> to vector<1x48xf32>
    %6 = arith.subf %2, %5 : vector<1x48xf32>
    %7 = math.exp %6 : vector<1x48xf32>
    %cst_4 = arith.constant dense<0.000000e+00> : vector<1xf32>
    %8 = vector.multi_reduction <add>, %7, %cst_4 [1] : vector<1x48xf32> to vector<1xf32>
    %9 = vector.shape_cast %8 : vector<1xf32> to vector<1x1xf32>
    %10 = tpu.reciprocal %9 {approx = true} : vector<1x1xf32> -> vector<1x1xf32>
    %cst_5 = arith.constant 3.000000e+00 : f32
    %11 = vector.broadcast %cst_5 : f32 to vector<1x1xf32>
    %12 = arith.mulf %10, %11 : vector<1x1xf32>
    %13 = vector.broadcast %12 : vector<1x1xf32> to vector<1x48xf32>
    %14 = arith.mulf %7, %13 : vector<1x48xf32>
    %15 = tpu.iota {dimensions = array<i32: 0>} : vector<3x48xi32>
    %16 = tpu.iota {dimensions = array<i32: 1>} : vector<3x48xi32>
    %c16_i32 = arith.constant 16 : i32
    %17 = vector.broadcast %c16_i32 : i32 to vector<3x48xi32>
    %18 = arith.muli %15, %17 : vector<3x48xi32>
    %19 = arith.cmpi sge, %16, %18 : vector<3x48xi32>
    %c1_i32 = arith.constant 1 : i32
    %20 = vector.broadcast %c1_i32 : i32 to vector<3x48xi32>
    %21 = arith.addi %15, %20 : vector<3x48xi32>
    %c16_i32_6 = arith.constant 16 : i32
    %22 = vector.broadcast %c16_i32_6 : i32 to vector<3x48xi32>
    %23 = arith.muli %21, %22 : vector<3x48xi32>
    %24 = arith.cmpi slt, %16, %23 : vector<3x48xi32>
    %25 = arith.andi %19, %24 : vector<3x48xi1>
    %26 = vector.shape_cast %14 : vector<1x48xf32> to vector<1x48xf32>
    %27 = vector.broadcast %26 : vector<1x48xf32> to vector<3x48xf32>
    %cst_7 = arith.constant 0.000000e+00 : f32
    %28 = vector.broadcast %cst_7 : f32 to vector<3x48xf32>
    %29 = arith.select %25, %27, %28 : vector<3x48xi1>, vector<3x48xf32>
    %c0_8 = arith.constant 0 : index
    %c0_9 = arith.constant 0 : index
    %30 = vector.load %arg2[%c0_8, %c0_9] : memref<48x256xf32, #tpu.memory_space<vmem>>, vector<48x256xf32>
    %cst_10 = arith.constant dense<0.000000e+00> : vector<3x256xf32>
    %31 = tpu.matmul %29, %30, %cst_10 {dimension_numbers = #tpu.dot_dimension_numbers<[1], [0], [0], [1], [0, 0, 1, 1], [], []>} : vector<3x48xf32>, vector<48x256xf32>, vector<3x256xf32> -> vector<3x256xf32>
    %c0_11 = arith.constant 0 : index
    %c0_12 = arith.constant 0 : index
    %32 = vector.load %arg4[%c0_11, %c0_12] : memref<3x256xf32, #tpu.memory_space<vmem>>, vector<3x256xf32>
    tpu.vector_store %arg4[%c0_11, %c0_12], %31 {strides = array<i32>} : memref<3x256xf32, #tpu.memory_space<vmem>>, vector<3x256xf32>,
    %c0_13 = arith.constant 0 : index
    %c68 = arith.constant 68 : index
    %33 = vector.load %arg3[%c0_13, %c68] : memref<8x640xf32, #tpu.memory_space<vmem>>, vector<8x512xf32>
    %c0_14 = arith.constant 0 : index
    %c0_15 = arith.constant 0 : index
    %34 = vector.load %arg6[%c0_14, %c0_15] : memref<200x512xf32, #tpu.memory_space<vmem>>, vector<8x512xf32>
    tpu.vector_store %arg6[%c0_14, %c0_15], %33 {strides = array<i32>} : memref<200x512xf32, #tpu.memory_space<vmem>>, vector<8x512xf32>,
    %c0_16 = arith.constant 0 : index
    %c67 = arith.constant 67 : index
    %35 = vector.load %arg3[%c0_16, %c67] : memref<8x640xf32, #tpu.memory_space<vmem>>, vector<8x512xf32>
    %c8 = arith.constant 8 : index
    %c0_17 = arith.constant 0 : index
    %36 = vector.load %arg6[%c8, %c0_17] : memref<200x512xf32, #tpu.memory_space<vmem>>, vector<8x512xf32>
    tpu.vector_store %arg6[%c8, %c0_17], %35 {strides = array<i32>} : memref<200x512xf32, #tpu.memory_space<vmem>>, vector<8x512xf32>,
    %c0_18 = arith.constant 0 : index
    %c66 = arith.constant 66 : index
    %37 = vector.load %arg3[%c0_18, %c66] : memref<8x640xf32, #tpu.memory_space<vmem>>, vector<8x512xf32>
    %c16 = arith.constant 16 : index
    %c0_19 = arith.constant 0 : index
    %38 = vector.load %arg6[%c16, %c0_19] : memref<200x512xf32, #tpu.memory_space<vmem>>, vector<8x512xf32>
    tpu.vector_store %arg6[%c16, %c0_19], %37 {strides = array<i32>} : memref<200x512xf32, #tpu.memory_space<vmem>>, vector<8x512xf32>,
    %c0_20 = arith.constant 0 : index
    %c65 = arith.constant 65 : index
    %39 = vector.load %arg3[%c0_20, %c65] : memref<8x640xf32, #tpu.memory_space<vmem>>, vector<8x512xf32>
    %c24 = arith.constant 24 : index
    %c0_21 = arith.constant 0 : index
    %40 = vector.load %arg6[%c24, %c0_21] : memref<200x512xf32, #tpu.memory_space<vmem>>, vector<8x512xf32>
    tpu.vector_store %arg6[%c24, %c0_21], %39 {strides = array<i32>} : memref<200x512xf32, #tpu.memory_space<vmem>>, vector<8x512xf32>,
    %c0_22 = arith.constant 0 : index
    %c64 = arith.constant 64 : index
    %41 = vector.load %arg3[%c0_22, %c64] : memref<8x640xf32, #tpu.memory_space<vmem>>, vector<8x512xf32>
    %c32 = arith.constant 32 : index
    %c0_23 = arith.constant 0 : index
    %42 = vector.load %arg6[%c32, %c0_23] : memref<200x512xf32, #tpu.memory_space<vmem>>, vector<8x512xf32>
    tpu.vector_store %arg6[%c32, %c0_23], %41 {strides = array<i32>} : memref<200x512xf32, #tpu.memory_space<vmem>>, vector<8x512xf32>,
    %c0_24 = arith.constant 0 : index
    %c52 = arith.constant 52 : index
    %43 = vector.load %arg3[%c0_24, %c52] : memref<8x640xf32, #tpu.memory_space<vmem>>, vector<8x512xf32>
    %c40 = arith.constant 40 : index
    %c0_25 = arith.constant 0 : index
    %44 = vector.load %arg6[%c40, %c0_25] : memref<200x512xf32, #tpu.memory_space<vmem>>, vector<8x512xf32>
    tpu.vector_store %arg6[%c40, %c0_25], %43 {strides = array<i32>} : memref<200x512xf32, #tpu.memory_space<vmem>>, vector<8x512xf32>,
    %c0_26 = arith.constant 0 : index
    %c51 = arith.constant 51 : index
    %45 = vector.load %arg3[%c0_26, %c51] : memref<8x640xf32, #tpu.memory_space<vmem>>, vector<8x512xf32>
    %c48 = arith.constant 48 : index
    %c0_27 = arith.constant 0 : index
    %46 = vector.load %arg6[%c48, %c0_27] : memref<200x512xf32, #tpu.memory_space<vmem>>, vector<8x512xf32>
    tpu.vector_store %arg6[%c48, %c0_27], %45 {strides = array<i32>} : memref<200x512xf32, #tpu.memory_space<vmem>>, vector<8x512xf32>,
    %c0_28 = arith.constant 0 : index
    %c50 = arith.constant 50 : index
    %47 = vector.load %arg3[%c0_28, %c50] : memref<8x640xf32, #tpu.memory_space<vmem>>, vector<8x512xf32>
    %c56 = arith.constant 56 : index
    %c0_29 = arith.constant 0 : index
    %48 = vector.load %arg6[%c56, %c0_29] : memref<200x512xf32, #tpu.memory_space<vmem>>, vector<8x512xf32>
    tpu.vector_store %arg6[%c56, %c0_29], %47 {strides = array<i32>} : memref<200x512xf32, #tpu.memory_space<vmem>>, vector<8x512xf32>,
    %c0_30 = arith.constant 0 : index
    %c49 = arith.constant 49 : index
    %49 = vector.load %arg3[%c0_30, %c49] : memref<8x640xf32, #tpu.memory_space<vmem>>, vector<8x512xf32>
    %c64_31 = arith.constant 64 : index
    %c0_32 = arith.constant 0 : index
    %50 = vector.load %arg6[%c64_31, %c0_32] : memref<200x512xf32, #tpu.memory_space<vmem>>, vector<8x512xf32>
    tpu.vector_store %arg6[%c64_31, %c0_32], %49 {strides = array<i32>} : memref<200x512xf32, #tpu.memory_space<vmem>>, vector<8x512xf32>,
    %c0_33 = arith.constant 0 : index
    %c48_34 = arith.constant 48 : index
    %51 = vector.load %arg3[%c0_33, %c48_34] : memref<8x640xf32, #tpu.memory_space<vmem>>, vector<8x512xf32>
    %c72 = arith.constant 72 : index
    %c0_35 = arith.constant 0 : index
    %52 = vector.load %arg6[%c72, %c0_35] : memref<200x512xf32, #tpu.memory_space<vmem>>, vector<8x512xf32>
    tpu.vector_store %arg6[%c72, %c0_35], %51 {strides = array<i32>} : memref<200x512xf32, #tpu.memory_space<vmem>>, vector<8x512xf32>,
    %c0_36 = arith.constant 0 : index
    %c36 = arith.constant 36 : index
    %53 = vector.load %arg3[%c0_36, %c36] : memref<8x640xf32, #tpu.memory_space<vmem>>, vector<8x512xf32>
    %c80 = arith.constant 80 : index
    %c0_37 = arith.constant 0 : index
    %54 = vector.load %arg6[%c80, %c0_37] : memref<200x512xf32, #tpu.memory_space<vmem>>, vector<8x512xf32>
    tpu.vector_store %arg6[%c80, %c0_37], %53 {strides = array<i32>} : memref<200x512xf32, #tpu.memory_space<vmem>>, vector<8x512xf32>,
    %c0_38 = arith.constant 0 : index
    %c35 = arith.constant 35 : index
    %55 = vector.load %arg3[%c0_38, %c35] : memref<8x640xf32, #tpu.memory_space<vmem>>, vector<8x512xf32>
    %c88 = arith.constant 88 : index
    %c0_39 = arith.constant 0 : index
    %56 = vector.load %arg6[%c88, %c0_39] : memref<200x512xf32, #tpu.memory_space<vmem>>, vector<8x512xf32>
    tpu.vector_store %arg6[%c88, %c0_39], %55 {strides = array<i32>} : memref<200x512xf32, #tpu.memory_space<vmem>>, vector<8x512xf32>,
    %c0_40 = arith.constant 0 : index
    %c34 = arith.constant 34 : index
    %57 = vector.load %arg3[%c0_40, %c34] : memref<8x640xf32, #tpu.memory_space<vmem>>, vector<8x512xf32>
    %c96 = arith.constant 96 : index
    %c0_41 = arith.constant 0 : index
    %58 = vector.load %arg6[%c96, %c0_41] : memref<200x512xf32, #tpu.memory_space<vmem>>, vector<8x512xf32>
    tpu.vector_store %arg6[%c96, %c0_41], %57 {strides = array<i32>} : memref<200x512xf32, #tpu.memory_space<vmem>>, vector<8x512xf32>,
    %c0_42 = arith.constant 0 : index
    %c33 = arith.constant 33 : index
    %59 = vector.load %arg3[%c0_42, %c33] : memref<8x640xf32, #tpu.memory_space<vmem>>, vector<8x512xf32>
    %c104 = arith.constant 104 : index
    %c0_43 = arith.constant 0 : index
    %60 = vector.load %arg6[%c104, %c0_43] : memref<200x512xf32, #tpu.memory_space<vmem>>, vector<8x512xf32>
    tpu.vector_store %arg6[%c104, %c0_43], %59 {strides = array<i32>} : memref<200x512xf32, #tpu.memory_space<vmem>>, vector<8x512xf32>,
    %c0_44 = arith.constant 0 : index
    %c32_45 = arith.constant 32 : index
    %61 = vector.load %arg3[%c0_44, %c32_45] : memref<8x640xf32, #tpu.memory_space<vmem>>, vector<8x512xf32>
    %c112 = arith.constant 112 : index
    %c0_46 = arith.constant 0 : index
    %62 = vector.load %arg6[%c112, %c0_46] : memref<200x512xf32, #tpu.memory_space<vmem>>, vector<8x512xf32>
    tpu.vector_store %arg6[%c112, %c0_46], %61 {strides = array<i32>} : memref<200x512xf32, #tpu.memory_space<vmem>>, vector<8x512xf32>,
    %c0_47 = arith.constant 0 : index
    %c20 = arith.constant 20 : index
    %63 = vector.load %arg3[%c0_47, %c20] : memref<8x640xf32, #tpu.memory_space<vmem>>, vector<8x512xf32>
    %c120 = arith.constant 120 : index
    %c0_48 = arith.constant 0 : index
    %64 = vector.load %arg6[%c120, %c0_48] : memref<200x512xf32, #tpu.memory_space<vmem>>, vector<8x512xf32>
    tpu.vector_store %arg6[%c120, %c0_48], %63 {strides = array<i32>} : memref<200x512xf32, #tpu.memory_space<vmem>>, vector<8x512xf32>,
    %c0_49 = arith.constant 0 : index
    %c19 = arith.constant 19 : index
    %65 = vector.load %arg3[%c0_49, %c19] : memref<8x640xf32, #tpu.memory_space<vmem>>, vector<8x512xf32>
    %c128 = arith.constant 128 : index
    %c0_50 = arith.constant 0 : index
    %66 = vector.load %arg6[%c128, %c0_50] : memref<200x512xf32, #tpu.memory_space<vmem>>, vector<8x512xf32>
    tpu.vector_store %arg6[%c128, %c0_50], %65 {strides = array<i32>} : memref<200x512xf32, #tpu.memory_space<vmem>>, vector<8x512xf32>,
    %c0_51 = arith.constant 0 : index
    %c18 = arith.constant 18 : index
    %67 = vector.load %arg3[%c0_51, %c18] : memref<8x640xf32, #tpu.memory_space<vmem>>, vector<8x512xf32>
    %c136 = arith.constant 136 : index
    %c0_52 = arith.constant 0 : index
    %68 = vector.load %arg6[%c136, %c0_52] : memref<200x512xf32, #tpu.memory_space<vmem>>, vector<8x512xf32>
    tpu.vector_store %arg6[%c136, %c0_52], %67 {strides = array<i32>} : memref<200x512xf32, #tpu.memory_space<vmem>>, vector<8x512xf32>,
    %c0_53 = arith.constant 0 : index
    %c17 = arith.constant 17 : index
    %69 = vector.load %arg3[%c0_53, %c17] : memref<8x640xf32, #tpu.memory_space<vmem>>, vector<8x512xf32>
    %c144 = arith.constant 144 : index
    %c0_54 = arith.constant 0 : index
    %70 = vector.load %arg6[%c144, %c0_54] : memref<200x512xf32, #tpu.memory_space<vmem>>, vector<8x512xf32>
    tpu.vector_store %arg6[%c144, %c0_54], %69 {strides = array<i32>} : memref<200x512xf32, #tpu.memory_space<vmem>>, vector<8x512xf32>,
    %c0_55 = arith.constant 0 : index
    %c16_56 = arith.constant 16 : index
    %71 = vector.load %arg3[%c0_55, %c16_56] : memref<8x640xf32, #tpu.memory_space<vmem>>, vector<8x512xf32>
    %c152 = arith.constant 152 : index
    %c0_57 = arith.constant 0 : index
    %72 = vector.load %arg6[%c152, %c0_57] : memref<200x512xf32, #tpu.memory_space<vmem>>, vector<8x512xf32>
    tpu.vector_store %arg6[%c152, %c0_57], %71 {strides = array<i32>} : memref<200x512xf32, #tpu.memory_space<vmem>>, vector<8x512xf32>,
    %c0_58 = arith.constant 0 : index
    %c4 = arith.constant 4 : index
    %73 = vector.load %arg3[%c0_58, %c4] : memref<8x640xf32, #tpu.memory_space<vmem>>, vector<8x512xf32>
    %c160 = arith.constant 160 : index
    %c0_59 = arith.constant 0 : index
    %74 = vector.load %arg6[%c160, %c0_59] : memref<200x512xf32, #tpu.memory_space<vmem>>, vector<8x512xf32>
    tpu.vector_store %arg6[%c160, %c0_59], %73 {strides = array<i32>} : memref<200x512xf32, #tpu.memory_space<vmem>>, vector<8x512xf32>,
    %c0_60 = arith.constant 0 : index
    %c3 = arith.constant 3 : index
    %75 = vector.load %arg3[%c0_60, %c3] : memref<8x640xf32, #tpu.memory_space<vmem>>, vector<8x512xf32>
    %c168 = arith.constant 168 : index
    %c0_61 = arith.constant 0 : index
    %76 = vector.load %arg6[%c168, %c0_61] : memref<200x512xf32, #tpu.memory_space<vmem>>, vector<8x512xf32>
    tpu.vector_store %arg6[%c168, %c0_61], %75 {strides = array<i32>} : memref<200x512xf32, #tpu.memory_space<vmem>>, vector<8x512xf32>,
    %c0_62 = arith.constant 0 : index
    %c2 = arith.constant 2 : index
    %77 = vector.load %arg3[%c0_62, %c2] : memref<8x640xf32, #tpu.memory_space<vmem>>, vector<8x512xf32>
    %c176 = arith.constant 176 : index
    %c0_63 = arith.constant 0 : index
    %78 = vector.load %arg6[%c176, %c0_63] : memref<200x512xf32, #tpu.memory_space<vmem>>, vector<8x512xf32>
    tpu.vector_store %arg6[%c176, %c0_63], %77 {strides = array<i32>} : memref<200x512xf32, #tpu.memory_space<vmem>>, vector<8x512xf32>,
    %c0_64 = arith.constant 0 : index
    %c1 = arith.constant 1 : index
    %79 = vector.load %arg3[%c0_64, %c1] : memref<8x640xf32, #tpu.memory_space<vmem>>, vector<8x512xf32>
    %c184 = arith.constant 184 : index
    %c0_65 = arith.constant 0 : index
    %80 = vector.load %arg6[%c184, %c0_65] : memref<200x512xf32, #tpu.memory_space<vmem>>, vector<8x512xf32>
    tpu.vector_store %arg6[%c184, %c0_65], %79 {strides = array<i32>} : memref<200x512xf32, #tpu.memory_space<vmem>>, vector<8x512xf32>,
    %c0_66 = arith.constant 0 : index
    %c0_67 = arith.constant 0 : index
    %81 = vector.load %arg3[%c0_66, %c0_67] : memref<8x640xf32, #tpu.memory_space<vmem>>, vector<8x512xf32>
    %c192 = arith.constant 192 : index
    %c0_68 = arith.constant 0 : index
    %82 = vector.load %arg6[%c192, %c0_68] : memref<200x512xf32, #tpu.memory_space<vmem>>, vector<8x512xf32>
    tpu.vector_store %arg6[%c192, %c0_68], %81 {strides = array<i32>} : memref<200x512xf32, #tpu.memory_space<vmem>>, vector<8x512xf32>,
    %83 = vector.extract_strided_slice %31 {offsets = [0, 0], sizes = [3, 200], strides = [1, 1]} : vector<3x256xf32> to vector<3x200xf32>
    %c0_69 = arith.constant 0 : index
    %c0_70 = arith.constant 0 : index
    %84 = vector.load %arg6[%c0_69, %c0_70] : memref<200x512xf32, #tpu.memory_space<vmem>>, vector<200x512xf32>
    %cst_71 = arith.constant dense<0.000000e+00> : vector<3x512xf32>
    %85 = tpu.matmul %83, %84, %cst_71 {dimension_numbers = #tpu.dot_dimension_numbers<[1], [0], [0], [1], [0, 0, 1, 1], [], []>} : vector<3x200xf32>, vector<200x512xf32>, vector<3x512xf32> -> vector<3x512xf32>
    %c0_72 = arith.constant 0 : index
    %c0_73 = arith.constant 0 : index
    %86 = vector.load %arg5[%c0_72, %c0_73] : memref<3x512xf32, #tpu.memory_space<vmem>>, vector<3x512xf32>
    tpu.vector_store %arg5[%c0_72, %c0_73], %85 {strides = array<i32>} : memref<3x512xf32, #tpu.memory_space<vmem>>, vector<3x512xf32>,
    return
  }
}

</mosaic_0001>

<bundles_post_ra>
// kernel: long_mem_forward.1
= control target key start
LH: loop header
LB: loop body
LE: loop exit
PB: predicated region body
PF: predicated region fallthrough
CT: control target
= control target key end

     0   :  { %s1580_s17 = smov 60   ;;  %s1581_s30 = smov 61   ;;  %vm135_vm0 = vcmask 385024   ;;  %vm276_vm1 = vcmask 498688   ;;  %vm243_vm2 = vcmask 490496   ;;  %vm309_vm3 = vcmask 506880   ;;  %s2540_s1 = inlined_call_operand.vmem [shape: f32[384,48], index: 1, kind: input, shape index: {}]   ;;  %s2541_s3 = inlined_call_operand.vmem [shape: f32[8,640], index: 3, kind: input, shape index: {}]   ;;  %s2542_s0 = inlined_call_operand.vmem [shape: f32[1,384], index: 0, kind: input, shape index: {}]   ;;  %s2543_s2 = inlined_call_operand.vmem [shape: f32[48,256], index: 2, kind: input, shape index: {}]   ;;  %s2544_s4 = inlined_call_operand.vmem [shape: f32[3,256], index: 4, kind: output, shape index: {0}]   ;;  %s2545_s5 = inlined_call_operand.vmem [shape: f32[3,512], index: 5, kind: output, shape index: {1}]  }
   0x1   :  { %v67_v0 = vld [vmem:[%s2540_s1 + $0x178] sm:$0xff]  ;;  %v66_v1 = vld [vmem:[%s2540_s1 + $0x170] sm:$0xff]  ;;  %v65_v5 = vld [vmem:[%s2540_s1 + $0x168] sm:$0xff]  ;;  %s1582_s28 = smov 63   ;;  %s1583_s29 = smov 62   ;;  %vm342_vm4 = vcmask 515072  }
   0x2   :  { %v35_v2 = vld [vmem:[%s2540_s1 + $0x78] sm:$0xff]  ;;  %115 = vmatpush.msra.mxu2 %v67_v0  ;;  %v34_v4 = vld [vmem:[%s2540_s1 + $0x70] sm:$0xff]  ;;  %v33_v7 = vld [vmem:[%s2540_s1 + $0x68] sm:$0xff]  ;;  %s1586_s6 = smov 77   ;;  %s1588_s7 = smov 79   ;;  %vm375_vm5 = vcmask 523264  }
   0x3   :  { %75 = vmatpush.msra.mxu0 %v35_v2  ;;  %v51_v3 = vld [vmem:[%s2540_s1 + $0xf8] sm:$0xff]  ;;  %v50_v6 = vld [vmem:[%s2540_s1 + $0xf0] sm:$0xff]  ;;  %v49_v8 = vld [vmem:[%s2540_s1 + $0xe8] sm:$0xff]  ;;  %s1589_s8 = smov 80   ;;  %s1590_s9 = smov 96   ;;  %vm408_vm6 = vcmask 621568  }
   0x4   :  { %95 = vmatpush.msra.mxu1 %v51_v3  ;;  %116 = vmatpush.msra.mxu2 %v66_v1  ;;  %v64_v9 = vld [vmem:[%s2540_s1 + $0x160] sm:$0xff]  ;;  %v63_v12 = vld [vmem:[%s2540_s1 + $0x158] sm:$0xff]  ;;  %v62_v15 = vld [vmem:[%s2540_s1 + $0x150] sm:$0xff]  ;;  %s1591_s10 = smov 108   ;;  %s1592_s11 = smov 93   ;;  %vm474_vm7 = vcmask 637952  }
   0x5   :  { %76 = vmatpush.msra.mxu0 %v34_v4  ;;  %v32_v10 = vld [vmem:[%s2540_s1 + $0x60] sm:$0xff]  ;;  %v31_v13 = vld [vmem:[%s2540_s1 + $0x58] sm:$0xff]  ;;  %v30_v16 = vld [vmem:[%s2540_s1 + $0x50] sm:$0xff]  ;;  %s1593_s12 = smov 95   ;;  %s1594_s13 = smov 92   ;;  %vm507_vm8 = vcmask 646144  }
   0x6   :  { %96 = vmatpush.msra.mxu1 %v50_v6  ;;  %117 = vmatpush.msra.mxu2 %v65_v5  ;;  %v48_v11 = vld [vmem:[%s2540_s1 + $0xe0] sm:$0xff]  ;;  %v47_v14 = vld [vmem:[%s2540_s1 + $0xd8] sm:$0xff]  ;;  %v46_v17 = vld [vmem:[%s2540_s1 + $0xd0] sm:$0xff]  ;;  %s1595_s14 = smov 94   ;;  %s1596_s15 = smov 124   ;;  %vm540_vm9 = vcmask 654336  }
   0x7   :  { %77 = vmatpush.msra.mxu0 %v33_v7  ;;  %v61_v18 = vld [vmem:[%s2540_s1 + $0x148] sm:$0xff]  ;;  %v60_v21 = vld [vmem:[%s2540_s1 + $0x140] sm:$0xff]  ;;  %v59_v24 = vld [vmem:[%s2540_s1 + $0x138] sm:$0xff]  ;;  %s1597_s16 = smov 126   ;;  %s1598_s18 = smov 127   ;;  %vm172_vm13 = vcmask 392192  }
   0x8   :  { %97 = vmatpush.msra.mxu1 %v49_v8  ;;  %118 = vmatpush.msra.mxu2 %v64_v9  ;;  %v29_v19 = vld [vmem:[%s2540_s1 + $0x48] sm:$0xff]  ;;  %v28_v22 = vld [vmem:[%s2540_s1 + $0x40] sm:$0xff]  ;;  %v27_v25 = vld [vmem:[%s2540_s1 + $0x38] sm:$0xff]  ;;  %s1599_s19 = smov 110   ;;  %s1600_s20 = smov 111   ;;  %vm738_vm14 = vcmask 883712  }
   0x9   :  { %78 = vmatpush.msra.mxu0 %v32_v10  ;;  %v45_v20 = vld [vmem:[%s2540_s1 + $0xc8] sm:$0xff]  ;;  %v44_v23 = vld [vmem:[%s2540_s1 + $0xc0] sm:$0xff]  ;;  %v58_v26 = vld [vmem:[%s2540_s1 + $0x130] sm:$0xff]  ;;  %s1601_s21 = smov 109   ;;  %s1602_s22 = smov 112   ;;  %vm639_vm15 = vcmask 769024  }
   0xa   :  { %98 = vmatpush.msra.mxu1 %v48_v11  ;;  %119 = vmatpush.msra.mxu2 %v63_v12  ;;  %v43_v27 = vld [vmem:[%s2540_s1 + $0xb8] sm:$0xff]  ;;  %v26_v28 = vld [vmem:[%s2540_s1 + $0x30] sm:$0xff]  ;;  %v1727_v30 = vld [vmem:[%s2541_s3] sm:$0xff] }
   0xb   :  { %79 = vmatpush.msra.mxu0 %v31_v13  ;;  %v42_v29 = vld [vmem:[%s2540_s1 + $0xb0] sm:$0xff]  ;;  %v1732_v31 = vld [vmem:[%s2541_s3 + $0x8] sm:$0xff]  ;;  %v1746_v34 = vld [vmem:[%s2541_s3 + $0x18] sm:$0xff] }
   0xc   :  { %99 = vmatpush.msra.mxu1 %v47_v14  ;;  %120 = vmatpush.msra.mxu2 %v62_v15  ;;  %v1736_v32 = vpack.i.bf16 %v1732_v31, %v1727_v30  ;;  %v1741_v33 = vld [vmem:[%s2541_s3 + $0x10] sm:$0xff]  ;;  %v1751_v35 = vld [vmem:[%s2541_s3 + $0x20] sm:$0xff]  ;;  %v57_v36 = vld [vmem:[%s2540_s1 + $0x128] sm:$0xff] }
   0xd   :  { %80 = vmatpush.msra.mxu0 %v30_v16  ;;  %v25_v37 = vld [vmem:[%s2540_s1 + $0x28] sm:$0xff]  ;;  %241 = vrot.lane.b32.xlu2 %v1751_v35, %s1580_s17  ;;  %v56_v39 = vld [vmem:[%s2540_s1 + $0x120] sm:$0xff]  ;;  %v1774_v41 = vpack.i.bf16 %v1746_v34, %v1741_v33  ;;  %v55_v43 = vld [vmem:[%s2540_s1 + $0x118] sm:$0xff] }
   0xe   :  { %100 = vmatpush.msra.mxu1 %v46_v17  ;;  %121 = vmatpush.msra.mxu2 %v61_v18  ;;  %v41_v38 = vld [vmem:[%s2540_s1 + $0xa8] sm:$0xff]  ;;  %v24_v40 = vld [vmem:[%s2540_s1 + $0x20] sm:$0xff]  ;;  %v23_v44 = vld [vmem:[%s2540_s1 + $0x18] sm:$0xff] }
   0xf   :  { %81 = vmatpush.msra.mxu0 %v29_v19  ;;  %1337 = vrot.lane.b32.xlu1 %v1736_v32, %s1580_s17  ;;  %v40_v42 = vld [vmem:[%s2540_s1 + $0xa0] sm:$0xff]  ;;  %v39_v45 = vld [vmem:[%s2540_s1 + $0x98] sm:$0xff]  ;;  %v54_v46 = vld [vmem:[%s2540_s1 + $0x110] sm:$0xff] }
  0x10   :  { %101 = vmatpush.msra.mxu1 %v45_v20  ;;  %122 = vmatpush.msra.mxu2 %v60_v21  ;;  %v22_v47 = vld [vmem:[%s2540_s1 + $0x10] sm:$0xff]  ;;  %v19_v49 = vld [vmem:[%s2542_s0] sm:$0x7]  ;;  %v53_v50 = vld [vmem:[%s2540_s1 + $0x108] sm:$0xff]  ;;  %s1603_s0 = smov 125  }
  0x11   :  { %82 = vmatpush.msra.mxu0 %v28_v22  ;;  %1352 = vrot.lane.b32.xlu0 %v1774_v41, %s1581_s30  ;;  %v38_v48 = vld [vmem:[%s2540_s1 + $0x90] sm:$0xff]  ;;  %v21_v51 = vld [vmem:[%s2540_s1 + $0x8] sm:$0xff]  ;;  %v52_v53 = vld [vmem:[%s2540_s1 + $0x100] sm:$0xff]  ;;  %v71_v54 = vperm.slane %v19_v49, 2  ;;  %v69_v57 = vperm.slane %v19_v49, 0  ;;  %v70_v58 = vperm.slane %v19_v49, 1 }
  0x12   :  { %102 = vmatpush.msra.mxu1 %v44_v23  ;;  %123 = vmatpush.msra.mxu2 %v59_v24  ;;  %v37_v52 = vld [vmem:[%s2540_s1 + $0x88] sm:$0xff]  ;;  %v20_v55 = vld [vmem:[%s2540_s1] sm:$0xff]  ;;  %v1923_v23 = vpack.i.bf16 %v1741_v33, %v1732_v31 }
  0x13   :  { %83 = vmatpush.msra.mxu0 %v27_v25  ;;  %v36_v56 = vld [vmem:[%s2540_s1 + $0x80] sm:$0xff]  ;;  %s1585_s1 = smov 76  }
  0x14   :  { %103 = vmatpush.msra.mxu1 %v43_v27  ;;  %124 = vmatpush.msra.mxu2 %v58_v26 }
  0x15   :  { %84 = vmatpush.msra.mxu0 %v26_v28  ;;  %1347 = vrot.lane.b32.xlu2 %v1736_v32, %s1581_s30  ;;  %v1942_v28 = vpack.i.bf16 %v1746_v34, %v1727_v30 }
  0x16   :  { %104 = vmatpush.msra.mxu1 %v42_v29  ;;  %125 = vmatpush.msra.mxu2 %v57_v36 }
  0x17   :  { %85 = vmatpush.msra.mxu0 %v25_v37  ;;  %1342 = vrot.lane.b32.xlu1 %v1774_v41, %s1580_s17  ;;  %s1584_s17 = smov 64  }
  0x18   :  { %105 = vmatpush.msra.mxu1 %v41_v38  ;;  %126 = vmatpush.msra.mxu2 %v56_v39 }
  0x19   :  { %86 = vmatpush.msra.mxu0 %v24_v40  ;;  %340 = vrot.lane.b32.xlu0 %v1751_v35, %s1582_s28 }
  0x1a   :  { %106 = vmatpush.msra.mxu1 %v40_v42  ;;  %127 = vmatpush.msra.mxu2 %v55_v43 }
  0x1b   :  { %87 = vmatpush.msra.mxu0 %v23_v44 }
  0x1c   :  { %107 = vmatpush.msra.mxu1 %v39_v45  ;;  %128 = vmatpush.msra.mxu2 %v54_v46 }
  0x1d   :  { %88 = vmatpush.msra.mxu0 %v22_v47  ;;  %1357 = vrot.lane.b32.xlu2 %v1736_v32, %s1583_s29 }
  0x1e   :  { %108 = vmatpush.msra.mxu1 %v38_v48  ;;  %129 = vmatpush.msra.mxu2 %v53_v50 }
  0x1f   :  { %89 = vmatpush.msra.mxu0 %v21_v51  ;;  %274 = vrot.lane.b32.xlu1 %v1751_v35, %s1581_s30  ;;  %s1587_s30 = smov 78  }
  0x20   :  { %109 = vmatpush.msra.mxu1 %v37_v52  ;;  %130 = vmatpush.msra.mxu2 %v52_v53 }
  0x21   :  { %90 = vmatpush.msra.mxu0 %v20_v55  ;;  %131 = vmatmul.f32.vlgmr.msra.gmra.mxu2 %v71_v54 }
  0x22   :  { %110 = vmatpush.msra.mxu1 %v36_v56  ;;  %91 = vmatmul.f32.vlgmr.msra.gmra.mxu0 %v69_v57  ;;  %v170_v57 = vld [vmem:[%s2543_s2 + $0x50] sm:$0xff] }
  0x23   :  { %111 = vmatmul.f32.vlgmr.msra.gmra.mxu1 %v70_v58  ;;  %373 = vrot.lane.b32.xlu0 %v1751_v35, %s1584_s17  ;;  %v171_v58 = vld [vmem:[%s2543_s2 + $0x58] sm:$0xff] }
  0x24   :  { %186 = vmatpush.msrb.mxu2 %v170_v57  ;;  %206 = vmatpush.msra.mxu3 %v171_v58 }
  0x25   :  { %307 = vrot.lane.b32.xlu2 %v1751_v35, %s1583_s29 }
  0x27   :  { %1362 = vrot.lane.b32.xlu1 %v1774_v41, %s1583_s29 }
  0x2b   :  { %406 = vrot.lane.b32.xlu0 %v1751_v35, %s1585_s1 }
  0x2d   :  { %1372 = vrot.lane.b32.xlu2 %v1774_v41, %s1582_s28 }
  0x2f   :  { %1367 = vrot.lane.b32.xlu1 %v1736_v32, %s1582_s28 }
  0x33   :  { %439 = vrot.lane.b32.xlu0 %v1751_v35, %s1586_s6 }
  0x35   :  { %1382 = vrot.lane.b32.xlu2 %v1774_v41, %s1584_s17 }
  0x37   :  { %1377 = vrot.lane.b32.xlu1 %v1736_v32, %s1584_s17 }
  0x3d   :  { %1392 = vrot.lane.b32.xlu2 %v1774_v41, %s1585_s1 }
  0x3f   :  { %1387 = vrot.lane.b32.xlu1 %v1736_v32, %s1585_s1 }
  0x45   :  { %1402 = vrot.lane.b32.xlu2 %v1774_v41, %s1586_s6 }
  0x47   :  { %1397 = vrot.lane.b32.xlu1 %v1736_v32, %s1586_s6 }
  0x4d   :  { %1412 = vrot.lane.b32.xlu2 %v1774_v41, %s1587_s30 }
  0x4f   :  { %1407 = vrot.lane.b32.xlu1 %v1736_v32, %s1587_s30 }
  0x55   :  { %1422 = vrot.lane.b32.xlu2 %v1774_v41, %s1588_s7 }
  0x57   :  { %1417 = vrot.lane.b32.xlu1 %v1736_v32, %s1588_s7 }
  0x5d   :  { %1432 = vrot.lane.b32.xlu2 %v1774_v41, %s1589_s8 }
  0x5f   :  { %1427 = vrot.lane.b32.xlu1 %v1736_v32, %s1589_s8 }
  0x65   :  { %1447 = vrot.lane.b32.xlu2 %v1736_v32, %s1593_s12 }
  0x67   :  { %1442 = vrot.lane.b32.xlu1 %v1736_v32, %s1590_s9  ;;  %v1859_v63 = vpop.permute.xlu2 %241 }
  0x6d   :  { %1462 = vrot.lane.b32.xlu2 %v1736_v32, %s1592_s11 }
  0x6f   :  { %1457 = vrot.lane.b32.xlu1 %v1774_v41, %s1591_s10  ;;  %v1865_v3 = vpop.permute.xlu2 %1347 }
  0x70   :  { %v2559_v4 = vunpack.i.h.bf16 %v1865_v3 }
  0x75   :  { %1472 = vrot.lane.b32.xlu2 %v1736_v32, %s1594_s13 }
  0x77   :  { %736 = vrot.lane.b32.xlu1 %v1751_v35, %s1591_s10  ;;  %v1911_v20 = vpop.permute.xlu2 %1357 }
  0x78   :  { %v2561_v36 = vunpack.i.h.bf16 %v1911_v20 }
  0x7d   :  { %1482 = vrot.lane.b32.xlu2 %v1774_v41, %s1595_s14 }
  0x7f   :  { %703 = vrot.lane.b32.xlu1 %v1751_v35, %s1590_s9  ;;  %v1927_v26 = vpop.permute.xlu2 %307 }
  0x81   :  { %v1907_v18 = vpop.permute.xlu1 %1337 }
  0x82   :  { %v2558_v24 = vunpack.i.h.bf16 %v1907_v18 }
  0x83   :  { %v1863_v2 = vpop.permute.xlu0 %1352 }
  0x84   :  { %v1354_v5 = vunpack.i.l.bf16 %v1863_v2  ;;  %v2550_v6 = vunpack.i.h.bf16 %v1863_v2 }
  0x85   :  { %637 = vrot.lane.b32.xlu2 %v1751_v35, %s1595_s14 }
  0x86   :  { %v1874_v7 = vsel %vm276_vm1, %v2559_v4, %v1354_v5  ;;  %v1879_v8 = vsel %vm276_vm1, %v1354_v5, %v2550_v6 }
  0x87   :  { %1487 = vrot.lane.b32.xlu1 %v1774_v41, %s1592_s11  ;;  %2574 = vst [vmem:[#allocation3_spill] sm:$0xff] %v1879_v8  ;;  %v1951_v33 = vpop.permute.xlu2 %1372 }
  0x88   :  { %v2546_v40 = vunpack.i.l.bf16 %v1951_v33 }
  0x89   :  { %v1909_v19 = vpop.permute.xlu1 %1342 }
  0x8a   :  { %v1344_v25 = vunpack.i.l.bf16 %v1909_v19  ;;  %v2549_v31 = vunpack.i.h.bf16 %v1909_v19 }
  0x8b   :  { %v1893_v9 = vpop.permute.xlu0 %340 }
  0x8c   :  { %v1936_v27 = vsel %vm243_vm2, %v2558_v24, %v1344_v25  ;;  %v1958_v30 = vsel %vm243_vm2, %v1344_v25, %v2549_v31  ;;  %v160_v25 = vld [vmem:[%s2543_s2] sm:$0xff] }
  0x8d   :  { %571 = vrot.lane.b32.xlu2 %v1751_v35, %s1594_s13  ;;  %2575 = vst [vmem:[#allocation4_spill] sm:$0xff] %v1958_v30 }
  0x8f   :  { %604 = vrot.lane.b32.xlu1 %v1751_v35, %s1592_s11  ;;  %v1973_v38 = vpop.permute.xlu2 %1382 }
  0x90   :  { %v2547_v47 = vunpack.i.l.bf16 %v1973_v38 }
  0x91   :  { %v1913_v21 = vpop.permute.xlu1 %274 }
  0x95   :  { %v1897_v10 = vpop.permute.xlu0 %373  ;;  %1502 = vrot.lane.b32.xlu2 %v1923_v23, %s1597_s16 }
  0x97   :  { %538 = vrot.lane.b32.xlu1 %v1751_v35, %s1589_s8  ;;  %v1991_v45 = vpop.permute.xlu2 %1392 }
  0x98   :  { %v2548_v52 = vunpack.i.l.bf16 %v1991_v45 }
  0x99   :  { %v1917_v22 = vpop.permute.xlu1 %1362 }
  0x9a   :  { %v2551_v39 = vunpack.i.h.bf16 %v1917_v22 }
  0x9d   :  { %v1899_v11 = vpop.permute.xlu0 %406  ;;  %1517 = vrot.lane.b32.xlu2 %v1942_v28, %s1598_s18 }
  0x9f   :  { %v92_v59 = vpop.f32.mrf.mxu0  ;;  %1512 = vrot.lane.b32.xlu1 %v1923_v23, %s1596_s15  ;;  %v2019_v51 = vpop.permute.xlu2 %1402 }
  0xa0   :  { %v112_v60 = vpop.f32.mrf.mxu1 }
  0xa1   :  { %v113_v61 = vadd.f32 %v112_v60, %v92_v59  ;;  %v1944_v29 = vpop.permute.xlu1 %1367  ;;  %v168_v60 = vld [vmem:[%s2543_s2 + $0x40] sm:$0xff] }
  0xa2   :  { %v2562_v42 = vunpack.i.h.bf16 %v1944_v29  ;;  %187 = vmatpush.msrb.mxu2 %v168_v60 }
  0xa4   :  { %v132_v62 = vpop.f32.mrf.mxu2  ;;  %v2000_v46 = vsel %vm342_vm4, %v2562_v42, %v2546_v40 }
  0xa5   :  { %v133_v0 = vadd.f32 %v132_v62, %v113_v61  ;;  %v1901_v12 = vpop.permute.xlu0 %439  ;;  %1532 = vrot.lane.b32.xlu2 %v1923_v23, %s1600_s20  ;;  %v169_v61 = vld [vmem:[%s2543_s2 + $0x48] sm:$0xff] }
  0xa6   :  { %207 = vmatpush.msra.mxu3 %v169_v61 }
  0xa7   :  { %v136_v1 = vsel %vm135_vm0, %v133_v0, -inf  ;;  %1527 = vrot.lane.b32.xlu1 %v1942_v28, %s1597_s16  ;;  %v2038_v55 = vpop.permute.xlu2 %1412 }
  0xa8   :  { %137 = vmax.xlane.f32.xlu0 %v136_v1  ;;  %v2554_v62 = vunpack.i.l.bf16 %v2038_v55  ;;  %v167_v1 = vld [vmem:[%s2543_s2 + $0x38] sm:$0xff]  ;;  %v2552_v5 = vunpack.i.h.bf16 %v2038_v55 }
  0xa9   :  { %v1971_v37 = vpop.permute.xlu1 %1377  ;;  %208 = vmatpush.msra.mxu3 %v167_v1 }
  0xaa   :  { %v2563_v48 = vunpack.i.h.bf16 %v1971_v37 }
  0xac   :  { %v2017_v50 = vsel %vm375_vm5, %v2563_v48, %v2547_v47 }
  0xad   :  { %1547 = vrot.lane.b32.xlu2 %v1942_v28, %s1596_s15 }
  0xaf   :  { %1542 = vrot.lane.b32.xlu1 %v1923_v23, %s1599_s19  ;;  %v2046_v56 = vpop.permute.xlu2 %1422 }
  0xb0   :  { %v2553_v58 = vunpack.i.h.bf16 %v2046_v56  ;;  %v2555_v60 = vunpack.i.l.bf16 %v2046_v56 }
  0xb1   :  { %v1984_v43 = vpop.permute.xlu1 %1387 }
  0xb5   :  { %1557 = vrot.lane.b32.xlu2 %v1942_v28, %s1602_s22 }
  0xb7   :  { %1552 = vrot.lane.b32.xlu1 %v1923_v23, %s1601_s21  ;;  %v2099_v57 = vpop.permute.xlu2 %1432 }
  0xb8   :  { %v2556_v1 = vunpack.i.h.bf16 %v2099_v57 }
  0xb9   :  { %v2008_v49 = vpop.permute.xlu1 %1397 }
  0xbc   :  { %472 = vrot.lane.b32.xlu0 %v1751_v35, %s1587_s30 }
  0xbd   :  { %934 = vrot.lane.b32.xlu2 %v1751_v35, %s1603_s0 }
  0xbf   :  { %1562 = vrot.lane.b32.xlu1 %v1942_v28, %s1600_s20 }
  0xc1   :  { %v2036_v54 = vpop.permute.xlu1 %1407 }
  0xc5   :  { %1572 = vrot.lane.b32.xlu2 %v1942_v28, %s1601_s21 }
  0xc7   :  { %901 = vrot.lane.b32.xlu1 %v1751_v35, %s1596_s15 }
  0xc9   :  { %v2056_v59 = vpop.permute.xlu1 %1417 }
  0xcd   :  { %802 = vrot.lane.b32.xlu2 %v1751_v35, %s1599_s19 }
  0xcf   :  { %835 = vrot.lane.b32.xlu1 %v1751_v35, %s1600_s20 }
  0xd1   :  { %v2103_v61 = vpop.permute.xlu1 %1427 }
 0x11b   :  { %v138_v13 = vpop.xlane.xlu0 %137 }
 0x11c   :  { %v139_v14 = vsub.f32 %v133_v0, %v138_v13  ;;  %v166_v0 = vld [vmem:[%s2543_s2 + $0x30] sm:$0xff]  ;;  %v164_v13 = vld [vmem:[%s2543_s2 + $0x20] sm:$0xff] }
 0x11d   :  { %188 = vmatpush.msrb.mxu2 %v166_v0  ;;  %v2112_v0 = vsel %vm507_vm8, %v2555_v60, %v2553_v58 }
 0x11e   :  { %v140_v15 = vmul.f32 1.442695, %v139_v14  ;;  %v165_v14 = vld [vmem:[%s2543_s2 + $0x28] sm:$0xff]  ;;  %2578 = vst [vmem:[#allocation7_spill] sm:$0xff] %v2112_v0 }
 0x11f   :  { %189 = vmatpush.msrb.mxu2 %v164_v13  ;;  %209 = vmatpush.msra.mxu3 %v165_v14  ;;  %v2557_v13 = vunpack.i.l.bf16 %v2099_v57  ;;  %v2116_v14 = vpop.permute.xlu2 %1447 }
 0x120   :  { %1576 = vpow2.f32 %v140_v15  ;;  %v162_v15 = vld [vmem:[%s2543_s2 + $0x10] sm:$0xff] }
 0x121   :  { %190 = vmatpush.msrb.mxu2 %v162_v15 }
 0x123   :  { %191 = vmatpush.msrb.mxu2 %v160_v25  ;;  %v2120_v25 = vpop.permute.xlu1 %1442 }
 0x126   :  { %v1903_v16 = vpop.eup %1576 }
 0x127   :  { %v142_v17 = vsel %vm135_vm0, %v1903_v16, 0.0  ;;  %v2133_v31 = vpop.permute.xlu2 %1462  ;;  %vm705_vm0 = vcmask 785408  }
 0x128   :  { %143 = vadd.xlane.f32.xlu0 %v142_v17  ;;  %v163_v17 = vld [vmem:[%s2543_s2 + $0x18] sm:$0xff] }
 0x129   :  { %210 = vmatpush.msra.mxu3 %v163_v17  ;;  %v148_v17 = vlaneseq }
 0x12b   :  { %v149_v40 = vshrl.u32 %v148_v17, 7  ;;  %v2135_v6 = vpop.permute.xlu1 %1457 }
 0x12c   :  { %v1459_v24 = vunpack.i.l.bf16 %v2135_v6 }
 0x12e   :  { %v2118_v15 = vpop.permute.xlu0 %472 }
 0x13c   :  { %505 = vrot.lane.b32.xlu0 %v1751_v35, %s1588_s7 }
 0x144   :  { %1437 = vrot.lane.b32.xlu0 %v1736_v32, %s1591_s10 }
 0x14c   :  { %1452 = vrot.lane.b32.xlu0 %v1736_v32, %s1595_s14  ;;  %v1364_v32 = vunpack.i.l.bf16 %v1917_v22 }
 0x14e   :  { %v1965_v34 = vsel %vm309_vm3, %v2561_v36, %v1364_v32  ;;  %v1989_v44 = vsel %vm309_vm3, %v1364_v32, %v2551_v39  ;;  %v161_v32 = vld [vmem:[%s2543_s2 + $0x8] sm:$0xff]  ;;  %v151_v39 = vand.u32 127, %v148_v17 }
 0x14f   :  { %2576 = vst [vmem:[#allocation5_spill] sm:$0xff] %v1989_v44  ;;  %211 = vmatpush.msra.mxu3 %v161_v32  ;;  %v2129_v32 = vsel %vm540_vm9, %v2557_v13, %v2556_v1  ;;  %v2560_v1 = vunpack.i.h.bf16 %v2135_v6  ;;  %v2141_v13 = vpop.permute.xlu2 %1472  ;;  %v2570_v44 = vunpack.i.h.bf16 %v2103_v61 }
 0x150   :  { %2579 = vst [vmem:[#allocation8_spill] sm:$0xff] %v2129_v32 }
 0x154   :  { %1467 = vrot.lane.b32.xlu0 %v1774_v41, %s1590_s9 }
 0x15c   :  { %1477 = vrot.lane.b32.xlu0 %v1774_v41, %s1593_s12 }
 0x164   :  { %670 = vrot.lane.b32.xlu0 %v1751_v35, %s1593_s12 }
 0x16c   :  { %1492 = vrot.lane.b32.xlu0 %v1774_v41, %s1594_s13  ;;  %v2566_v41 = vunpack.i.h.bf16 %v1984_v43 }
 0x16e   :  { %v2034_v53 = vsel %vm408_vm6, %v2566_v41, %v2548_v52  ;;  %v154_v52 = vadd.s32 1, %v149_v40  ;;  %v2568_v41 = vunpack.i.h.bf16 %v2133_v31 }
 0x170   :  { %v155_v58 = vmul.u32 16, %v154_v52 }
 0x172   :  { %vm156_vm11 = vcmp.lt.s32.totalorder %v151_v39, %v155_v58  ;;  %v1445_v58 = vunpack.i.h.bf16 %v2120_v25 }
 0x174   :  { %1497 = vrot.lane.b32.xlu0 %v1923_v23, %s1598_s18 }
 0x17c   :  { %1507 = vrot.lane.b32.xlu0 %v1923_v23, %s1603_s0 }
 0x184   :  { %1522 = vrot.lane.b32.xlu0 %v1923_v23, %s1602_s22  ;;  %v2091_v23 = vsel %vm474_vm7, %v2554_v62, %v2552_v5  ;;  %v152_v5 = vmul.u32 16, %v149_v40  ;;  %v2144_v40 = vpop.permute.xlu1 %736 }
 0x185   :  { %2577 = vst [vmem:[#allocation6_spill] sm:$0xff] %v2091_v23 }
 0x186   :  { %vm153_vm10 = vcmp.ge.s32.totalorder %v151_v39, %v152_v5  ;;  %v2149_v39 = vsel %vm738_vm14, %v1459_v24, %v2560_v1  ;;  %v1449_v1 = vunpack.i.l.bf16 %v2116_v14 }
 0x187   :  { %vm157_vm12 = vmand %vm153_vm10, %vm156_vm11  ;;  %2580 = vst [vmem:[#allocation9_spill] sm:$0xff] %v2149_v39  ;;  %vm672_vm10 = vcmask 777216   ;;  %vm606_vm11 = vcmask 760832   ;;  %v2585_v39 = vunpack.i.h.bf16 %v1984_v43 }
 0x18c   :  { %1537 = vrot.lane.b32.xlu0 %v1942_v28, %s1603_s0  ;;  %v2158_v5 = vpop.permute.xlu1 %703 }
 0x194   :  { %1000 = vrot.lane.b32.xlu0 %v1751_v35, %s1598_s18 }
 0x19b   :  { %v144_v47 = vpop.xlane.xlu0 %143 }
 0x19c   :  { %1578 = vrcp.f32 %v144_v47  ;;  %967 = vrot.lane.b32.xlu0 %v1751_v35, %s1597_s16 }
 0x1a2   :  { %v1579_v62 = vpop.eup %1578 }
 0x1a3   :  { %v146_v60 = vmul.f32 3.0, %v1579_v62 }
 0x1a4   :  { %1567 = vrot.lane.b32.xlu0 %v1942_v28, %s1599_s19  ;;  %v2155_v28 = vpop.permute.xlu2 %1482 }
 0x1a5   :  { %v147_v47 = vmul.f32 %v1903_v16, %v146_v60  ;;  %v2564_v62 = vunpack.i.h.bf16 %v2155_v28  ;;  %v1444_v60 = vunpack.i.l.bf16 %v2120_v25 }
 0x1a7   :  { %v158_v4 = vperm.slane %v147_v47, 0  ;;  %v706_v25 = vsel %vm705_vm0, %v1444_v60, %v1445_v58 }
 0x1a9   :  { %v159_v52 = vsel %vm157_vm12, %v158_v4, 0.0  ;;  %v2565_v4 = vunpack.i.l.bf16 %v2155_v28  ;;  %vm573_vm12 = vcmask 752640  }
 0x1aa   :  { %1306 = vmatmul.msk.f32.vlgmr.msrb.gmra.mxu2 %vm172_vm13, %v159_v52  ;;  %1307 = vmatmul.msk.f32.vlgmr.msra.gmra.mxu3 %vm172_vm13, %v159_v52  ;;  %v2567_v52 = vunpack.i.h.bf16 %v2116_v14  ;;  %vm441_vm13 = vcmask 629760  }
 0x1ab   :  { %v2170_v17 = vsel %vm639_vm15, %v2565_v4, %v2564_v62  ;;  %v2180_v4 = vpop.permute.xlu1 %1487 }
 0x1ac   :  { %868 = vrot.lane.b32.xlu0 %v1751_v35, %s1602_s22  ;;  %2581 = vst [vmem:[#allocation10_spill] sm:$0xff] %v2170_v17  ;;  %v673_v62 = vsel %vm672_vm10, %v1449_v1, %v2567_v52  ;;  %v2569_v30 = vunpack.i.h.bf16 %v2180_v4  ;;  %v1489_v1 = vunpack.i.l.bf16 %v2180_v4 }
 0x1ae   :  { %v2153_v16 = vpop.permute.xlu0 %505  ;;  %v2201_v52 = vsel %vm606_vm11, %v1489_v1, %v2569_v30  ;;  %v2571_v30 = vunpack.i.h.bf16 %v2056_v59 }
 0x1af   :  { %2582 = vst [vmem:[#allocation11_spill] sm:$0xff] %v2201_v52 }
 0x1b4   :  { %769 = vrot.lane.b32.xlu0 %v1751_v35, %s1601_s21 }
 0x1b6   :  { %v1438_v47 = vpop.permute.xlu0 %1437 }
 0x1b7   :  { %v1440_v36 = vunpack.i.h.bf16 %v1438_v47  ;;  %v1439_v35 = vunpack.i.l.bf16 %v1438_v47  ;;  %v1464_v47 = vunpack.i.l.bf16 %v2133_v31 }
 0x1b9   :  { %v739_v42 = vsel %vm738_vm14, %v1439_v35, %v1440_v36  ;;  %v740_v48 = vsel %vm738_vm14, %v1440_v36, %v1459_v24  ;;  %v1474_v36 = vunpack.i.l.bf16 %v2141_v13  ;;  %v1429_v24 = vunpack.i.l.bf16 %v2103_v61 }
 0x1ba   :  { %1126 = vmatpush.msrb.mxu3 %v739_v42  ;;  %1166 = vmatpush.msrb.mxu1 %v740_v48 }
 0x1bb   :  { %v541_v32 = vsel %vm540_vm9, %v1429_v24, %v2570_v44  ;;  %v1389_v24 = vunpack.i.l.bf16 %v1984_v43  ;;  %v2573_v44 = vunpack.i.h.bf16 %v2008_v49  ;;  %v1349_v43 = vunpack.i.l.bf16 %v1865_v3 }
 0x1bc   :  { %1127 = vmatpush.msrb.mxu3 %v706_v25  ;;  %v607_v25 = vsel %vm606_vm11, %v1464_v47, %v2568_v41  ;;  %v1409_v47 = vunpack.i.l.bf16 %v2036_v54 }
 0x1be   :  { %v2185_v35 = vpop.permute.xlu0 %1452  ;;  %1128 = vmatpush.msrb.mxu3 %v673_v62  ;;  %v2196_v62 = vpop.permute.xlu2 %637 }
 0x1bf   :  { %v1455_v42 = vunpack.i.h.bf16 %v2185_v35  ;;  %v1454_v48 = vunpack.i.l.bf16 %v2185_v35  ;;  %v2583_v35 = vunpack.i.h.bf16 %v2141_v13 }
 0x1c1   :  { %v640_v60 = vsel %vm639_vm15, %v1454_v48, %v1455_v42  ;;  %v574_v8 = vsel %vm573_vm12, %v1474_v36, %v2583_v35  ;;  %v1419_v48 = vunpack.i.l.bf16 %v2056_v59  ;;  %v1399_v36 = vunpack.i.l.bf16 %v2008_v49 }
 0x1c2   :  { %1129 = vmatpush.msrb.mxu3 %v640_v60  ;;  %v2210_v60 = vpop.permute.xlu1 %604 }
 0x1c3   :  { %v508_v35 = vsel %vm507_vm8, %v1419_v48, %v2571_v30  ;;  %v1379_v30 = vunpack.i.l.bf16 %v1971_v37 }
 0x1c4   :  { %1130 = vmatpush.msrb.mxu3 %v607_v25  ;;  %v2572_v25 = vunpack.i.h.bf16 %v2036_v54 }
 0x1c6   :  { %v1468_v41 = vpop.permute.xlu0 %1467  ;;  %1131 = vmatpush.msrb.mxu3 %v574_v8  ;;  %v1015_v8 = vld [vmem:[%s2541_s3] sm:$0xff]  ;;  %v572_v48 = vpop.permute.xlu2 %571 }
 0x1c7   :  { %v1470_v23 = vunpack.i.h.bf16 %v1468_v41  ;;  %v1469_v0 = vunpack.i.l.bf16 %v1468_v41  ;;  %v1016_v41 = vld [vmem:[%s2541_s3 + $0x8] sm:$0xff]  ;;  %1153 = vmatpush.msrb.mxu0 %v1015_v8 }
 0x1c8   :  { %1132 = vmatpush.msrb.mxu3 %v541_v32  ;;  %1193 = vmatpush.msra.mxu2 %v1016_v41  ;;  %v1359_v41 = vunpack.i.l.bf16 %v1911_v20 }
 0x1c9   :  { %v707_v52 = vsel %vm705_vm0, %v1445_v58, %v1469_v0  ;;  %v2229_v32 = vsel %vm705_vm0, %v1469_v0, %v1470_v23  ;;  %v475_v58 = vsel %vm474_vm7, %v1409_v47, %v2572_v25  ;;  %v442_v0 = vsel %vm441_vm13, %v1399_v36, %v2573_v44 }
 0x1ca   :  { %1133 = vmatpush.msrb.mxu3 %v508_v35  ;;  %1167 = vmatpush.msrb.mxu1 %v707_v52  ;;  %2584 = vst [vmem:[#allocation12_spill] sm:$0xff] %v2229_v32  ;;  %v1369_v35 = vunpack.i.l.bf16 %v1944_v29  ;;  %v409_v47 = vsel %vm408_vm6, %v1389_v24, %v2585_v39  ;;  %v539_v8 = vpop.permute.xlu1 %538  ;;  %v2587_v36 = vunpack.i.h.bf16 %v2116_v14  ;;  %v2588_v39 = vunpack.i.h.bf16 %v1944_v29 }
 0x1cb   :  { %v2590_v14 = vunpack.i.h.bf16 %v1911_v20  ;;  %v2593_v20 = vunpack.i.h.bf16 %v1907_v18 }
 0x1cc   :  { %1134 = vmatpush.msrb.mxu3 %v475_v58  ;;  %v2586_v58 = vunpack.i.h.bf16 %v1971_v37  ;;  %v343_v24 = vsel %vm342_vm4, %v1369_v35, %v2588_v39  ;;  %v2592_v35 = vunpack.i.h.bf16 %v1865_v3 }
 0x1ce   :  { %v1478_v52 = vpop.permute.xlu0 %1477  ;;  %1135 = vmatpush.msrb.mxu3 %v442_v0  ;;  %v376_v25 = vsel %vm375_vm5, %v1379_v30, %v2586_v58  ;;  %v1339_v30 = vunpack.i.l.bf16 %v1907_v18  ;;  %v2268_v29 = vpop.permute.xlu2 %1502 }
 0x1cf   :  { %v1480_v17 = vunpack.i.h.bf16 %v1478_v52  ;;  %v1479_v32 = vunpack.i.l.bf16 %v1478_v52  ;;  %v2589_v52 = vunpack.i.l.bf16 %v2155_v28 }
 0x1d0   :  { %1136 = vmatpush.msrb.mxu3 %v409_v47 }
 0x1d1   :  { %v674_v0 = vsel %vm672_vm10, %v2587_v36, %v1479_v32  ;;  %v2252_v44 = vsel %vm672_vm10, %v1479_v32, %v1480_v17  ;;  %v641_v37 = vsel %vm639_vm15, %v1455_v42, %v2589_v52  ;;  %v310_v32 = vsel %vm309_vm3, %v1359_v41, %v2590_v14 }
 0x1d2   :  { %1137 = vmatpush.msrb.mxu3 %v376_v25  ;;  %1168 = vmatpush.msrb.mxu1 %v674_v0  ;;  %v2591_v25 = vunpack.i.h.bf16 %v2133_v31  ;;  %v277_v42 = vsel %vm276_vm1, %v1349_v43, %v2592_v35  ;;  %v2273_v36 = vpop.permute.xlu1 %1512  ;;  %v244_v41 = vsel %vm243_vm2, %v1339_v30, %v2593_v20  ;;  %v2594_v31 = vunpack.i.h.bf16 %v2135_v6 }
 0x1d3   :  { %v709_v0 = vsel %vm705_vm0, %v1470_v23, %v2158_v5  ;;  %v2595_v52 = vunpack.i.h.bf16 %v2155_v28  ;;  %v2597_v23 = vunpack.i.h.bf16 %v2141_v13  ;;  %v1404_v14 = vunpack.i.l.bf16 %v2019_v51 }
 0x1d4   :  { %1138 = vmatpush.msrb.mxu3 %v343_v24  ;;  %1169 = vmatpush.msrb.mxu1 %v641_v37  ;;  %v608_v47 = vsel %vm606_vm11, %v2591_v25, %v1489_v1  ;;  %v742_v1 = vsel %vm738_vm14, %v2594_v31, %v2144_v40  ;;  %v2596_v40 = vunpack.i.h.bf16 %v2180_v4  ;;  %v2599_v4 = vunpack.i.h.bf16 %v2103_v61 }
 0x1d5   :  { %v643_v6 = vsel %vm639_vm15, %v2595_v52, %v2196_v62  ;;  %v2598_v62 = vunpack.i.l.bf16 %v2099_v57  ;;  %v1504_v13 = vunpack.i.l.bf16 %v2268_v29  ;;  %v1505_v61 = vunpack.i.h.bf16 %v2268_v29 }
 0x1d6   :  { %v671_v58 = vpop.permute.xlu0 %670  ;;  %1139 = vmatpush.msrb.mxu3 %v310_v32  ;;  %1170 = vmatpush.msrb.mxu1 %v608_v47  ;;  %v2285_v18 = vpop.permute.xlu2 %1517  ;;  %v610_v37 = vsel %vm606_vm11, %v2596_v40, %v2210_v60  ;;  %v2600_v47 = vunpack.i.l.bf16 %v2046_v56  ;;  %vm1002_vm14 = vcmask 1039360   ;;  %vm969_vm15 = vcmask 1031168  }
 0x1d7   :  { %v676_v43 = vsel %vm672_vm10, %v1480_v17, %v671_v58  ;;  %v542_v60 = vsel %vm540_vm9, %v2599_v4, %v2598_v62  ;;  %v1519_v32 = vunpack.i.l.bf16 %v2285_v18  ;;  %v971_v40 = vsel %vm969_vm15, %v1504_v13, %v1505_v61 }
 0x1d8   :  { %1140 = vmatpush.msrb.mxu3 %v277_v42  ;;  %v2602_v42 = vunpack.i.h.bf16 %v2099_v57  ;;  %v2605_v57 = vunpack.i.h.bf16 %v2046_v56  ;;  %vm804_vm0 = vcmask 900096   ;;  %vm219_vm10 = vcmask 1043456  }
 0x1da   :  { %1141 = vmatpush.msrb.mxu3 %v244_v41  ;;  %v2301_v30 = vpop.permute.xlu1 %1527  ;;  %v544_v20 = vsel %vm540_vm9, %v2602_v42, %v539_v8  ;;  %v511_v8 = vsel %vm507_vm8, %v2605_v57, %v2153_v16  ;;  %v2607_v16 = vunpack.i.h.bf16 %v2038_v55  ;;  %vm837_vm9 = vcmask 908288  }
 0x1db   :  { %v1529_v25 = vunpack.i.l.bf16 %v2301_v30 }
 0x1dc   :  { %1246 = vmatpush.msra.mxu3 %v742_v1  ;;  %v2604_v1 = vunpack.i.h.bf16 %v2036_v54 }
 0x1dd   :  { %v970_v52 = vsel %vm969_vm15, %v1529_v25, %v1504_v13  ;;  %v2608_v13 = vunpack.i.h.bf16 %v1917_v22 }
 0x1de   :  { %1247 = vmatpush.msra.mxu3 %v709_v0  ;;  %v1493_v3 = vpop.permute.xlu0 %1492  ;;  %v2347_v56 = vpop.permute.xlu2 %1532 }
 0x1df   :  { %v1495_v39 = vunpack.i.h.bf16 %v1493_v3  ;;  %v1494_v24 = vunpack.i.l.bf16 %v1493_v3  ;;  %v1405_v3 = vunpack.i.h.bf16 %v2019_v51  ;;  %v1535_v25 = vunpack.i.h.bf16 %v2347_v56 }
 0x1e0   :  { %1248 = vmatpush.msra.mxu3 %v676_v43  ;;  %v2606_v43 = vunpack.i.h.bf16 %v2008_v49  ;;  %v478_v49 = vsel %vm474_vm7, %v2607_v16, %v2118_v15  ;;  %v1515_v15 = vunpack.i.h.bf16 %v2273_v36  ;;  %v2619_v51 = vunpack.i.l.bf16 %v1973_v38 }
 0x1e1   :  { %v575_v5 = vsel %vm573_vm12, %v2597_v23, %v1494_v24  ;;  %v2299_v17 = vsel %vm573_vm12, %v1494_v24, %v1495_v39  ;;  %v577_v28 = vsel %vm573_vm12, %v1495_v39, %v572_v48  ;;  %v2601_v48 = vunpack.i.h.bf16 %v2056_v59 }
 0x1e2   :  { %1249 = vmatpush.msra.mxu3 %v643_v6  ;;  %1171 = vmatpush.msrb.mxu1 %v575_v5  ;;  %v2603_v59 = vunpack.i.l.bf16 %v2038_v55  ;;  %v443_v39 = vsel %vm441_vm13, %v2606_v43, %v1404_v14  ;;  %v1395_v6 = vunpack.i.h.bf16 %v1991_v45  ;;  %v2357_v23 = vpop.permute.xlu1 %1542  ;;  %v445_v55 = vsel %vm441_vm13, %v1405_v3, %v1901_v12  ;;  %v1017_v43 = vld [vmem:[%s2541_s3 + $0x10] sm:$0xff] }
 0x1e3   :  { %v509_v58 = vsel %vm507_vm8, %v2601_v48, %v2600_v47  ;;  %v1514_v5 = vunpack.i.l.bf16 %v2273_v36  ;;  %vm903_vm8 = vcmask 1014784  }
 0x1e4   :  { %1250 = vmatpush.msra.mxu3 %v610_v37  ;;  %1172 = vmatpush.msrb.mxu1 %v542_v60  ;;  %v476_v0 = vsel %vm474_vm7, %v2604_v1, %v2603_v59  ;;  %v1385_v37 = vunpack.i.h.bf16 %v1973_v38  ;;  %vm936_vm7 = vcmask 1022976   ;;  %v2623_v38 = vld [vmem:[#allocation4_spill] sm:$0xff] }
 0x1e6   :  { %1251 = vmatpush.msra.mxu3 %v577_v28  ;;  %v2319_v35 = vpop.permute.xlu0 %1497  ;;  %1173 = vmatpush.msrb.mxu1 %v509_v58  ;;  %v1375_v28 = vunpack.i.h.bf16 %v1951_v33  ;;  %v379_v60 = vsel %vm375_vm5, %v1385_v37, %v1897_v10  ;;  %v2394_v10 = vpop.permute.xlu2 %1547  ;;  %v1544_v58 = vunpack.i.l.bf16 %v2357_v23 }
 0x1e7   :  { %v1500_v41 = vunpack.i.h.bf16 %v2319_v35  ;;  %v1499_v31 = vunpack.i.l.bf16 %v2319_v35 }
 0x1e8   :  { %1252 = vmatpush.msra.mxu3 %v544_v20  ;;  %1174 = vmatpush.msrb.mxu1 %v476_v0  ;;  %v1520_v0 = vunpack.i.h.bf16 %v2285_v18 }
 0x1e9   :  { %v1003_v24 = vsel %vm1002_vm14, %v1519_v32, %v1499_v31  ;;  %v1004_v54 = vsel %vm1002_vm14, %v1499_v31, %v1500_v41  ;;  %v313_v32 = vsel %vm309_vm3, %v2608_v13, %v1927_v26  ;;  %vm870_vm3 = vcmask 916480  }
 0x1ea   :  { %1253 = vmatpush.msra.mxu3 %v511_v8  ;;  %1175 = vmatpush.msrb.mxu1 %v443_v39  ;;  %v2406_v47 = vpop.permute.xlu1 %1552  ;;  %v1545_v26 = vunpack.i.h.bf16 %v2357_v23  ;;  %v2610_v31 = vunpack.i.h.bf16 %v1909_v19  ;;  %v1549_v39 = vunpack.i.l.bf16 %v2394_v10 }
 0x1eb   :  { %1154 = vmatpush.msrb.mxu0 %v1003_v24  ;;  %1194 = vmatpush.msra.mxu2 %v1004_v54  ;;  %v1530_v54 = vunpack.i.h.bf16 %v2301_v30 }
 0x1ec   :  { %1254 = vmatpush.msra.mxu3 %v478_v49  ;;  %1176 = vmatpush.msrb.mxu1 %v2034_v53  ;;  %v412_v53 = vsel %vm408_vm6, %v1395_v6, %v1899_v11  ;;  %v905_v11 = vsel %vm903_vm8, %v1514_v5, %v1515_v15  ;;  %v904_v30 = vsel %vm903_vm8, %v1549_v39, %v1514_v5  ;;  %v2617_v39 = vld [vmem:[#allocation6_spill] sm:$0xff] }
 0x1ed   :  { %1155 = vmatpush.msrb.mxu0 %v970_v52  ;;  %1195 = vmatpush.msra.mxu2 %v971_v40  ;;  %v1005_v40 = vsel %vm1002_vm14, %v1500_v41, %v1520_v0 }
 0x1ee   :  { %1255 = vmatpush.msra.mxu3 %v445_v55  ;;  %v2367_v62 = vpop.permute.xlu0 %1507  ;;  %1177 = vmatpush.msrb.mxu1 %v2017_v50  ;;  %v2436_v57 = vpop.permute.xlu2 %1557 }
 0x1ef   :  { %v1510_v12 = vunpack.i.h.bf16 %v2367_v62  ;;  %v1509_v4 = vunpack.i.l.bf16 %v2367_v62  ;;  %v1559_v16 = vunpack.i.l.bf16 %v2436_v57  ;;  %v1560_v35 = vunpack.i.h.bf16 %v2436_v57  ;;  %v2615_v57 = vld [vmem:[#allocation8_spill] sm:$0xff] }
 0x1f0   :  { %1256 = vmatpush.msra.mxu3 %v412_v53  ;;  %1178 = vmatpush.msrb.mxu1 %v2000_v46  ;;  %v346_v46 = vsel %vm342_vm4, %v1375_v28, %v1893_v9  ;;  %v1534_v9 = vunpack.i.l.bf16 %v2347_v56  ;;  %v1550_v53 = vunpack.i.h.bf16 %v2394_v10 }
 0x1f1   :  { %v938_v50 = vsel %vm936_vm7, %v1509_v4, %v1510_v12 }
 0x1f2   :  { %1257 = vmatpush.msra.mxu3 %v379_v60  ;;  %1179 = vmatpush.msrb.mxu1 %v1965_v34  ;;  %v1018_v34 = vld [vmem:[%s2541_s3 + $0x18] sm:$0xff]  ;;  %v839_v1 = vsel %vm837_vm9, %v1534_v9, %v1535_v25  ;;  %v2443_v52 = vpop.permute.xlu1 %1562 }
 0x1f3   :  { %1196 = vmatpush.msra.mxu2 %v938_v50  ;;  %v1564_v55 = vunpack.i.l.bf16 %v2443_v52  ;;  %v1565_v29 = vunpack.i.h.bf16 %v2443_v52  ;;  %v2618_v52 = vunpack.i.l.bf16 %v1991_v45 }
 0x1f4   :  { %1258 = vmatpush.msra.mxu3 %v346_v46  ;;  %1180 = vmatpush.msrb.mxu1 %v1874_v7  ;;  %v2609_v7 = vunpack.i.h.bf16 %v1863_v2  ;;  %v1555_v2 = vunpack.i.h.bf16 %v2406_v47 }
 0x1f5   :  { %1197 = vmatpush.msra.mxu2 %v905_v11  ;;  %v838_v5 = vsel %vm837_vm9, %v1564_v55, %v1534_v9 }
 0x1f6   :  { %1259 = vmatpush.msra.mxu3 %v313_v32  ;;  %v1523_v48 = vpop.permute.xlu0 %1522  ;;  %1181 = vmatpush.msrb.mxu1 %v1936_v27  ;;  %v280_v22 = vsel %vm276_vm1, %v2609_v7, %v1913_v21  ;;  %v247_v27 = vsel %vm243_vm2, %v2610_v31, %v1859_v63  ;;  %v1554_v21 = vunpack.i.l.bf16 %v2406_v47  ;;  %vm771_vm1 = vcmask 891904   ;;  %v935_v62 = vpop.permute.xlu2 %934  ;;  %v2613_v47 = vld [vmem:[#allocation10_spill] sm:$0xff] }
 0x1f7   :  { %v1525_v42 = vunpack.i.h.bf16 %v1523_v48  ;;  %v1524_v20 = vunpack.i.l.bf16 %v1523_v48  ;;  %v806_v63 = vsel %vm804_vm0, %v1544_v58, %v1545_v26  ;;  %vm1123_vm2 = vcmask 588800  }
 0x1f8   :  { %1260 = vmatpush.msra.mxu3 %v280_v22  ;;  %1273 = vmatpush.msra.mxu1 %v1018_v34  ;;  %v773_v19 = vsel %vm771_vm1, %v1554_v21, %v1555_v2 }
 0x1f9   :  { %v872_v59 = vsel %vm870_vm3, %v1524_v20, %v1525_v42  ;;  %v871_v60 = vsel %vm870_vm3, %v1559_v16, %v1524_v20  ;;  %v873_v46 = vsel %vm870_vm3, %v1525_v42, %v1560_v35  ;;  %v411_v16 = vsel %vm408_vm6, %v2618_v52, %v1395_v6  ;;  %v2621_v6 = vld [vmem:[#allocation5_spill] sm:$0xff] }
 0x1fa   :  { %1261 = vmatpush.msra.mxu3 %v247_v27  ;;  %1198 = vmatpush.msra.mxu2 %v872_v59  ;;  %v902_v32 = vpop.permute.xlu1 %901  ;;  %v2611_v27 = vld [vmem:[#allocation9_spill] sm:$0xff] }
 0x1fb   :  { %v907_v36 = vsel %vm903_vm8, %v1550_v53, %v902_v32 }
 0x1fc   :  { %1199 = vmatpush.msra.mxu2 %v839_v1  ;;  %v2612_v1 = vld [vmem:[#allocation12_spill] sm:$0xff] }
 0x1fe   :  { %v1538_v8 = vpop.permute.xlu0 %1537  ;;  %1200 = vmatpush.msra.mxu2 %v806_v63  ;;  %v2614_v63 = vld [vmem:[#allocation11_spill] sm:$0xff] }
 0x1ff   :  { %v1539_v24 = vunpack.i.l.bf16 %v1538_v8  ;;  %v1540_v49 = vunpack.i.h.bf16 %v1538_v8  ;;  %v2616_v8 = vld [vmem:[#allocation7_spill] sm:$0xff] }
 0x200   :  { %1201 = vmatpush.msra.mxu2 %v773_v19 }
 0x201   :  { %v937_v18 = vsel %vm936_vm7, %v1539_v24, %v1509_v4  ;;  %v972_v4 = vsel %vm969_vm15, %v1505_v61, %v1530_v54  ;;  %v939_v50 = vsel %vm936_vm7, %v1510_v12, %v1540_v49  ;;  %v906_v61 = vsel %vm903_vm8, %v1515_v15, %v1550_v53  ;;  %v1573_v15 = vpop.permute.xlu2 %1572 }
 0x202   :  { %1233 = vmatpush.msrb.mxu2 %v1017_v43  ;;  %1156 = vmatpush.msrb.mxu0 %v937_v18  ;;  %v840_v12 = vsel %vm837_vm9, %v1535_v25, %v1565_v29  ;;  %v940_v34 = vsel %vm936_vm7, %v1540_v49, %v935_v62  ;;  %v1575_v48 = vunpack.i.h.bf16 %v1573_v15  ;;  %v1574_v7 = vunpack.i.l.bf16 %v1573_v15  ;;  %v836_v59 = vpop.permute.xlu1 %835  ;;  %v2622_v18 = vld [vmem:[#allocation3_spill] sm:$0xff] }
 0x204   :  { %1234 = vmatpush.msrb.mxu2 %v1005_v40  ;;  %1157 = vmatpush.msrb.mxu0 %v904_v30  ;;  %v772_v20 = vsel %vm771_vm1, %v1574_v7, %v1554_v21  ;;  %v774_v31 = vsel %vm771_vm1, %v1555_v2, %v1575_v48  ;;  %v841_v21 = vsel %vm837_vm9, %v1565_v29, %v836_v59 }
 0x206   :  { %1235 = vmatpush.msrb.mxu2 %v972_v4  ;;  %v1001_v41 = vpop.permute.xlu0 %1000  ;;  %1158 = vmatpush.msrb.mxu0 %v871_v60 }
 0x207   :  { %v1006_v11 = vsel %vm1002_vm14, %v1520_v0, %v1001_v41 }
 0x208   :  { %1236 = vmatpush.msrb.mxu2 %v939_v50  ;;  %1159 = vmatpush.msrb.mxu0 %v838_v5 }
 0x209   :  { %1274 = vmatpush.msra.mxu1 %v1006_v11 }
 0x20a   :  { %1237 = vmatpush.msrb.mxu2 %v906_v61 }
 0x20c   :  { %1238 = vmatpush.msrb.mxu2 %v873_v46 }
 0x20e   :  { %1239 = vmatpush.msrb.mxu2 %v840_v12  ;;  %v968_v10 = vpop.permute.xlu0 %967 }
 0x20f   :  { %v973_v13 = vsel %vm969_vm15, %v1530_v54, %v968_v10 }
 0x210   :  { %1275 = vmatpush.msra.mxu1 %v973_v13 }
 0x212   :  { %1276 = vmatpush.msra.mxu1 %v940_v34 }
 0x214   :  { %1277 = vmatpush.msra.mxu1 %v907_v36 }
 0x216   :  { %v1568_v9 = vpop.permute.xlu0 %1567 }
 0x217   :  { %v1570_v22 = vunpack.i.h.bf16 %v1568_v9  ;;  %v1569_v56 = vunpack.i.l.bf16 %v1568_v9 }
 0x219   :  { %v805_v25 = vsel %vm804_vm0, %v1569_v56, %v1544_v58  ;;  %v807_v42 = vsel %vm804_vm0, %v1545_v26, %v1570_v22  ;;  %v803_v26 = vpop.permute.xlu2 %802 }
 0x21a   :  { %1160 = vmatpush.msrb.mxu0 %v805_v25  ;;  %1240 = vmatpush.msrb.mxu2 %v807_v42  ;;  %v808_v2 = vsel %vm804_vm0, %v1570_v22, %v803_v26 }
 0x21c   :  { %1161 = vmatpush.msrb.mxu0 %v772_v20  ;;  %1241 = vmatpush.msrb.mxu2 %v774_v31 }
 0x21e   :  { %1206 = vmatpush.msra.mxu0 %v2611_v27  ;;  %v869_v58 = vpop.permute.xlu0 %868 }
 0x21f   :  { %v874_v23 = vsel %vm870_vm3, %v1560_v35, %v869_v58 }
 0x220   :  { %1207 = vmatpush.msra.mxu0 %v2612_v1  ;;  %1278 = vmatpush.msra.mxu1 %v874_v23 }
 0x222   :  { %1208 = vmatpush.msra.mxu0 %v2252_v44  ;;  %1279 = vmatpush.msra.mxu1 %v841_v21 }
 0x224   :  { %1209 = vmatpush.msra.mxu0 %v2613_v47  ;;  %1280 = vmatpush.msra.mxu1 %v808_v2 }
 0x226   :  { %1210 = vmatpush.msra.mxu0 %v2614_v63  ;;  %v770_v19 = vpop.permute.xlu0 %769 }
 0x227   :  { %v775_v0 = vsel %vm771_vm1, %v1575_v48, %v770_v19 }
 0x228   :  { %1211 = vmatpush.msra.mxu0 %v2299_v17  ;;  %1281 = vmatpush.msra.mxu1 %v775_v0  ;;  %v444_v17 = vsel %vm441_vm13, %v1404_v14, %v1405_v3  ;;  %v378_v14 = vsel %vm375_vm5, %v2619_v51, %v1385_v37  ;;  %v2620_v3 = vunpack.i.l.bf16 %v1951_v33 }
 0x22a   :  { %1212 = vmatpush.msra.mxu0 %v2615_v57  ;;  %v345_v45 = vsel %vm342_vm4, %v2620_v3, %v1375_v28 }
 0x22c   :  { %1213 = vmatpush.msra.mxu0 %v2616_v8 }
 0x22d   :  { %v193_v44 = vpop.f32.mrf.mxu2  ;;  %v213_v43 = vpop.f32.mrf.mxu3 }
 0x22e   :  { %1214 = vmatpush.msra.mxu0 %v2617_v39  ;;  %v218_v24 = vrot.slane %v213_v43, 4  ;;  %1142 = vmatmul.f32.vlgmr.msrb.gmra.mxu3 %v193_v44 }
 0x22f   :  { %1308 = vmatmul.msk.f32.vlgmr.msrb.gmra.mxu0 %vm1123_vm2, %v213_v43  ;;  %1182 = vmatmul.f32.vlgmr.msrb.gmra.mxu1 %v193_v44 }
 0x230   :  { %1309 = vmatmul.msk.f32.vlgmr.msra.gmra.mxu2 %vm1123_vm2, %v213_v43  ;;  %1215 = vmatpush.msra.mxu0 %v444_v17  ;;  %v220_v54 = vsel %vm219_vm10, %v193_v44, %v218_v24 }
 0x231   :  { %222 = vst [vmem:[%s2544_s4] sm:$0x77] %v220_v54 }
 0x232   :  { %1216 = vmatpush.msra.mxu0 %v411_v16 }
 0x234   :  { %1217 = vmatpush.msra.mxu0 %v378_v14 }
 0x236   :  { %1218 = vmatpush.msra.mxu0 %v345_v45  ;;  %1262 = vmatmul.f32.vlgmr.msra.gmra.mxu3 %v193_v44 }
 0x237   :  { %1311 = vmatmul.msk.f32.vlgmr.msra.gmra.mxu1 %vm1123_vm2, %v213_v43 }
 0x238   :  { %1310 = vmatmul.msk.f32.vlgmr.msrb.gmra.mxu2 %vm1123_vm2, %v213_v43  ;;  %1219 = vmatpush.msra.mxu0 %v2621_v6 }
 0x23a   :  { %1220 = vmatpush.msra.mxu0 %v2622_v18 }
 0x23c   :  { %1221 = vmatpush.msra.mxu0 %v2623_v38 }
 0x23d   :  { %1222 = vmatmul.f32.vlgmr.msra.gmra.mxu0 %v193_v44 }
 0x2ac   :  { %v1183_v37 = vpop.f32.mrf.mxu1  ;;  %v1163_v40 = vpop.f32.mrf.mxu0 }
 0x2b1   :  { %v1143_v49 = vpop.f32.mrf.mxu3 }
 0x2b2   :  { %v1164_v30 = vadd.f32 %v1163_v40, %v1143_v49 }
 0x2b3   :  { %v1203_v55 = vpop.f32.mrf.mxu2 }
 0x2b4   :  { %v1204_v33 = vadd.f32 %v1203_v55, %v1183_v37  ;;  %v1283_v4 = vpop.f32.mrf.mxu1 }
 0x2b6   :  { %v1290_v28 = vrot.slane %v1204_v33, 4 }
 0x2b8   :  { %v1292_v53 = vsel %vm219_vm10, %v1164_v30, %v1290_v28 }
 0x2b9   :  { %1296 = vst [vmem:[%s2545_s5] sm:$0x77] %v1292_v53  ;;  %v1263_v60 = vpop.f32.mrf.mxu3 }
 0x2ba   :  { %v1223_v35 = vpop.f32.mrf.mxu0  ;;  %v1284_v50 = vadd.f32 %v1283_v4, %v1263_v60 }
 0x2bb   :  { %v1243_v41 = vpop.f32.mrf.mxu2 }
 0x2bc   :  { %v1244_v5 = vadd.f32 %v1243_v41, %v1223_v35  ;;  %v1291_v11 = vrot.slane %v1284_v50, 4 }
 0x2be   :  { %v1293_v29 = vsel %vm219_vm10, %v1244_v5, %v1291_v11 }
 0x2bf   :  { %1297 = vst [vmem:[%s2545_s5 + $0x8] sm:$0x77] %v1293_v29 }

</bundles_post_ra>
